<compile_context>
chip_gen: v7x
topology: tpu7x:2x2x1
jax: 0.10.0
libtpu: 0.0.40
codegen_flags: <defaults>
</compile_context>

<pallas_src>
import jax
import jax.numpy as jnp
from jax import lax
from jax.experimental import pallas as pl
from jax.experimental.pallas import tpu as pltpu


def _dot_rhs_t(w, x):
    """(H, F) x (TB, F) -> (H, TB):  W @ x^T without materializing x^T in HBM."""
    return lax.dot_general(w, x, (((1,), (1,)), ((), ())),
                           preferred_element_type=jnp.float32)


def _critic_kernel(s_ref, a_ref, w1s_ref, w1a_ref, b1_ref,
                   w2_ref, b2_ref, w3_ref, b3_ref, o_ref):
    # Layer 1 (feature-major): h1 = relu(W1_s @ s^T + W1_a @ a^T + b1) -> (H, TB)
    h1 = (_dot_rhs_t(w1s_ref[...], s_ref[...])
          + _dot_rhs_t(w1a_ref[...], a_ref[...])
          + b1_ref[...])
    h1 = jnp.maximum(h1, 0.0)

    # Layer 2: h2 = relu(W2 @ h1 + b2) -> (H, TB)
    h2 = jnp.dot(w2_ref[...], h1, preferred_element_type=jnp.float32) + b2_ref[...]
    h2 = jnp.maximum(h2, 0.0)

    # Layer 3: out = W3 @ h2 + b3 -> (O, TB); batch on lanes => lane-dense store.
    out = jnp.dot(w3_ref[...], h2, preferred_element_type=jnp.float32) + b3_ref[...]
    o_ref[...] = out.astype(o_ref.dtype)


def critic_forward(s, a, params, *, block_b=1024):
    """Pallas forward for Critic. s: (B, s_dim), a: (B, a_dim) -> (B, out)."""
    w1, b1, w2, b2, w3, b3 = params          # PyTorch layout: W (out, in), b (out,)
    B, s_dim = s.shape
    a_dim = a.shape[1]
    H = w1.shape[0]
    O = w3.shape[0]

    # --- wrapper-side layout plumbing (tiny, one-time XLA ops) ---
    w1s = w1[:, :s_dim]                      # (H, s_dim)  -> avoids in-kernel concat
    w1a = w1[:, s_dim:]                      # (H, a_dim)
    b1c = b1.reshape(H, 1)                   # column biases broadcast along lanes
    b2c = b2.reshape(H, 1)
    b3c = b3.reshape(O, 1)

    # --- batch tiling: single full block when small, 128-aligned tiles when large ---
    if B <= block_b:
        TB, grid_n, Bp = B, 1, B             # block == full array -> no (8,128) constraint
        sp, ap = s, a
    else:
        assert block_b % 128 == 0, "block_b must be a multiple of 128"
        TB = block_b
        grid_n = pl.cdiv(B, TB)
        Bp = grid_n * TB
        pad = Bp - B
        sp = jnp.pad(s, ((0, pad), (0, 0))) if pad else s   # padded rows sliced off below
        ap = jnp.pad(a, ((0, pad), (0, 0))) if pad else a

    full = lambda arr: pl.BlockSpec(arr.shape, lambda i: (0, 0))   # VMEM-resident weights

    out_T = pl.pallas_call(
        _critic_kernel,
        out_shape=jax.ShapeDtypeStruct((O, Bp), jnp.float32),
        grid=(grid_n,),
        in_specs=[
            pl.BlockSpec((TB, s_dim), lambda i: (i, 0)),   # batch-major stream of s
            pl.BlockSpec((TB, a_dim), lambda i: (i, 0)),   # batch-major stream of a
            full(w1s), full(w1a), full(b1c),
            full(w2), full(b2c),
            full(w3), full(b3c),
        ],
        out_specs=pl.BlockSpec((O, TB), lambda i: (0, i)),  # lane-dense (batch on lanes)
        compiler_params=pltpu.CompilerParams(dimension_semantics=("parallel",)),
    )(sp, ap, w1s, w1a, b1c, w2, b2c, w3, b3c)

    return out_T[:, :B].T                    # back to (B, O); tiny (O == 1) transpose


def init_critic_params(key, input_size, hidden_size, output_size):
    """Deterministic init mirroring nn.Linear shapes: W (out, in), b (out,)."""
    ks = jax.random.split(key, 6)

    def linear(kw, kb, fan_in, fan_out):
        bound = 1.0 / jnp.sqrt(fan_in)
        w = jax.random.uniform(kw, (fan_out, fan_in), jnp.float32, -bound, bound)
        b = jax.random.uniform(kb, (fan_out,), jnp.float32, -bound, bound)
        return w, b

    w1, b1 = linear(ks[0], ks[1], input_size, hidden_size)
    w2, b2 = linear(ks[2], ks[3], hidden_size, hidden_size)
    w3, b3 = linear(ks[4], ks[5], hidden_size, output_size)
    return (w1, b1, w2, b2, w3, b3)


def critic_ref(s, a, params):
    """Pure-JAX reference (matches the PyTorch forward)."""
    w1, b1, w2, b2, w3, b3 = params
    x = jnp.concatenate([s, a], axis=1)
    x = jnp.maximum(x @ w1.T + b1, 0.0)
    x = jnp.maximum(x @ w2.T + b2, 0.0)
    return x @ w3.T + b3


if __name__ == "__main__":
    key = jax.random.PRNGKey(0)
    k_s, k_a, k_p, k_s2, k_a2 = jax.random.split(key, 5)

    state_dim = 24
    action_dim = 8
    input_size = state_dim + action_dim   # 32
    hidden_size = 32
    output_size = 1
    params = init_critic_params(k_p, input_size, hidden_size, output_size)

    # Small case (single full-block grid point).
    batch = 8
    s = jax.random.normal(k_s, (batch, state_dim), jnp.float32)
    a = jax.random.normal(k_a, (batch, action_dim), jnp.float32)
    out = jax.block_until_ready(critic_forward(s, a, params))
    ref = critic_ref(s, a, params)
    assert out.shape == (batch, output_size)
    assert jnp.allclose(out, ref, atol=1e-4, rtol=1e-5), "mismatch vs JAX reference (small batch)"

    # Larger batch exercising the tiled 'parallel' grid + padding path.
    batch2 = 1300
    s2 = jax.random.normal(k_s2, (batch2, state_dim), jnp.float32)
    a2 = jax.random.normal(k_a2, (batch2, action_dim), jnp.float32)
    out2 = jax.block_until_ready(critic_forward(s2, a2, params, block_b=512))
    ref2 = critic_ref(s2, a2, params)
    assert out2.shape == (batch2, output_size)
    assert jnp.allclose(out2, ref2, atol=1e-4, rtol=1e-5), "mismatch vs JAX reference (tiled batch)"

    print("KERNEL_OK")
</pallas_src>

<mosaic_0001>
module attributes {stable_mosaic.version = 11 : i64} {
  func.func @_critic_kernel(%arg0: i32, %arg1: memref<8x24xf32, #tpu.memory_space<vmem>>, %arg2: memref<8x8xf32, #tpu.memory_space<vmem>>, %arg3: memref<32x24xf32, #tpu.memory_space<vmem>>, %arg4: memref<32x8xf32, #tpu.memory_space<vmem>>, %arg5: memref<32x1xf32, #tpu.memory_space<vmem>>, %arg6: memref<32x32xf32, #tpu.memory_space<vmem>>, %arg7: memref<32x1xf32, #tpu.memory_space<vmem>>, %arg8: memref<1x32xf32, #tpu.memory_space<vmem>>, %arg9: memref<1x1xf32, #tpu.memory_space<vmem>>, %arg10: memref<1x8xf32, #tpu.memory_space<vmem>>) attributes {dimension_semantics = [#tpu.dimension_semantics<parallel>], iteration_bounds = array<i64: 1>, scalar_prefetch = 0 : i64, scratch_operands = 0 : i64, tpu.core_type = #tpu.core_type<tc>, window_params = [{transform_indices = @transform_0, window_bounds = array<i64: 8, 24>}, {transform_indices = @transform_1, window_bounds = array<i64: 8, 8>}, {pipeline_mode = #tpu.pipeline_mode<synchronous>, transform_indices = @transform_2, window_bounds = array<i64: 32, 24>}, {pipeline_mode = #tpu.pipeline_mode<synchronous>, transform_indices = @transform_3, window_bounds = array<i64: 32, 8>}, {pipeline_mode = #tpu.pipeline_mode<synchronous>, transform_indices = @transform_4, window_bounds = array<i64: 32, 1>}, {pipeline_mode = #tpu.pipeline_mode<synchronous>, transform_indices = @transform_5, window_bounds = array<i64: 32, 32>}, {pipeline_mode = #tpu.pipeline_mode<synchronous>, transform_indices = @transform_6, window_bounds = array<i64: 32, 1>}, {pipeline_mode = #tpu.pipeline_mode<synchronous>, transform_indices = @transform_7, window_bounds = array<i64: 1, 32>}, {pipeline_mode = #tpu.pipeline_mode<synchronous>, transform_indices = @transform_8, window_bounds = array<i64: 1, 1>}, {transform_indices = @transform_9, window_bounds = array<i64: 1, 8>}]} {
    %c0 = arith.constant 0 : index
    %c0_0 = arith.constant 0 : index
    %0 = vector.load %arg3[%c0, %c0_0] : memref<32x24xf32, #tpu.memory_space<vmem>>, vector<32x24xf32>
    %c0_1 = arith.constant 0 : index
    %c0_2 = arith.constant 0 : index
    %1 = vector.load %arg1[%c0_1, %c0_2] : memref<8x24xf32, #tpu.memory_space<vmem>>, vector<8x24xf32>
    %cst = arith.constant dense<0.000000e+00> : vector<32x8xf32>
    %2 = tpu.matmul %0, %1, %cst {dimension_numbers = #tpu.dot_dimension_numbers<[1], [1], [0], [0], [0, 0, 1, 0], [], []>} : vector<32x24xf32>, vector<8x24xf32>, vector<32x8xf32> -> vector<32x8xf32>
    %c0_3 = arith.constant 0 : index
    %c0_4 = arith.constant 0 : index
    %3 = vector.load %arg4[%c0_3, %c0_4] : memref<32x8xf32, #tpu.memory_space<vmem>>, vector<32x8xf32>
    %c0_5 = arith.constant 0 : index
    %c0_6 = arith.constant 0 : index
    %4 = vector.load %arg2[%c0_5, %c0_6] : memref<8x8xf32, #tpu.memory_space<vmem>>, vector<8x8xf32>
    %cst_7 = arith.constant dense<0.000000e+00> : vector<32x8xf32>
    %5 = tpu.matmul %3, %4, %cst_7 {dimension_numbers = #tpu.dot_dimension_numbers<[1], [1], [0], [0], [0, 0, 1, 0], [], []>} : vector<32x8xf32>, vector<8x8xf32>, vector<32x8xf32> -> vector<32x8xf32>
    %6 = arith.addf %2, %5 : vector<32x8xf32>
    %c0_8 = arith.constant 0 : index
    %c0_9 = arith.constant 0 : index
    %7 = vector.load %arg5[%c0_8, %c0_9] : memref<32x1xf32, #tpu.memory_space<vmem>>, vector<32x1xf32>
    %8 = vector.broadcast %7 : vector<32x1xf32> to vector<32x8xf32>
    %9 = arith.addf %6, %8 : vector<32x8xf32>
    %cst_10 = arith.constant 0.000000e+00 : f32
    %10 = vector.broadcast %cst_10 : f32 to vector<32x8xf32>
    %11 = arith.maximumf %9, %10 : vector<32x8xf32>
    %c0_11 = arith.constant 0 : index
    %c0_12 = arith.constant 0 : index
    %12 = vector.load %arg6[%c0_11, %c0_12] : memref<32x32xf32, #tpu.memory_space<vmem>>, vector<32x32xf32>
    %cst_13 = arith.constant dense<0.000000e+00> : vector<32x8xf32>
    %13 = tpu.matmul %12, %11, %cst_13 {dimension_numbers = #tpu.dot_dimension_numbers<[1], [0], [0], [1], [0, 0, 1, 1], [], []>} : vector<32x32xf32>, vector<32x8xf32>, vector<32x8xf32> -> vector<32x8xf32>
    %c0_14 = arith.constant 0 : index
    %c0_15 = arith.constant 0 : index
    %14 = vector.load %arg7[%c0_14, %c0_15] : memref<32x1xf32, #tpu.memory_space<vmem>>, vector<32x1xf32>
    %15 = vector.broadcast %14 : vector<32x1xf32> to vector<32x8xf32>
    %16 = arith.addf %13, %15 : vector<32x8xf32>
    %cst_16 = arith.constant 0.000000e+00 : f32
    %17 = vector.broadcast %cst_16 : f32 to vector<32x8xf32>
    %18 = arith.maximumf %16, %17 : vector<32x8xf32>
    %c0_17 = arith.constant 0 : index
    %c0_18 = arith.constant 0 : index
    %19 = vector.load %arg8[%c0_17, %c0_18] : memref<1x32xf32, #tpu.memory_space<vmem>>, vector<1x32xf32>
    %cst_19 = arith.constant dense<0.000000e+00> : vector<1x8xf32>
    %20 = tpu.matmul %19, %18, %cst_19 {dimension_numbers = #tpu.dot_dimension_numbers<[1], [0], [0], [1], [0, 0, 1, 1], [], []>} : vector<1x32xf32>, vector<32x8xf32>, vector<1x8xf32> -> vector<1x8xf32>
    %c0_20 = arith.constant 0 : index
    %c0_21 = arith.constant 0 : index
    %21 = vector.load %arg9[%c0_20, %c0_21] : memref<1x1xf32, #tpu.memory_space<vmem>>, vector<1x1xf32>
    %22 = vector.broadcast %21 : vector<1x1xf32> to vector<1x8xf32>
    %23 = arith.addf %20, %22 : vector<1x8xf32>
    %c0_22 = arith.constant 0 : index
    %c0_23 = arith.constant 0 : index
    %24 = vector.load %arg10[%c0_22, %c0_23] : memref<1x8xf32, #tpu.memory_space<vmem>>, vector<1x8xf32>
    tpu.vector_store %arg10[%c0_22, %c0_23], %23 {strides = array<i32>} : memref<1x8xf32, #tpu.memory_space<vmem>>, vector<1x8xf32>,
    return
  }
  func.func @transform_0(%arg0: i32) -> (i32, i32) {
    %c0_i32 = arith.constant 0 : i32
    %c0_i32_0 = arith.constant 0 : i32
    return %arg0, %c0_i32 : i32, i32
  }
  func.func @transform_1(%arg0: i32) -> (i32, i32) {
    %c0_i32 = arith.constant 0 : i32
    %c0_i32_0 = arith.constant 0 : i32
    return %arg0, %c0_i32 : i32, i32
  }
  func.func @transform_2(%arg0: i32) -> (i32, i32) {
    %c0_i32 = arith.constant 0 : i32
    %c0_i32_0 = arith.constant 0 : i32
    %c0_i32_1 = arith.constant 0 : i32
    return %c0_i32, %c0_i32_0 : i32, i32
  }
  func.func @transform_3(%arg0: i32) -> (i32, i32) {
    %c0_i32 = arith.constant 0 : i32
    %c0_i32_0 = arith.constant 0 : i32
    %c0_i32_1 = arith.constant 0 : i32
    return %c0_i32, %c0_i32_0 : i32, i32
  }
  func.func @transform_4(%arg0: i32) -> (i32, i32) {
    %c0_i32 = arith.constant 0 : i32
    %c0_i32_0 = arith.constant 0 : i32
    %c0_i32_1 = arith.constant 0 : i32
    return %c0_i32, %c0_i32_0 : i32, i32
  }
  func.func @transform_5(%arg0: i32) -> (i32, i32) {
    %c0_i32 = arith.constant 0 : i32
    %c0_i32_0 = arith.constant 0 : i32
    %c0_i32_1 = arith.constant 0 : i32
    return %c0_i32, %c0_i32_0 : i32, i32
  }
  func.func @transform_6(%arg0: i32) -> (i32, i32) {
    %c0_i32 = arith.constant 0 : i32
    %c0_i32_0 = arith.constant 0 : i32
    %c0_i32_1 = arith.constant 0 : i32
    return %c0_i32, %c0_i32_0 : i32, i32
  }
  func.func @transform_7(%arg0: i32) -> (i32, i32) {
    %c0_i32 = arith.constant 0 : i32
    %c0_i32_0 = arith.constant 0 : i32
    %c0_i32_1 = arith.constant 0 : i32
    return %c0_i32, %c0_i32_0 : i32, i32
  }
  func.func @transform_8(%arg0: i32) -> (i32, i32) {
    %c0_i32 = arith.constant 0 : i32
    %c0_i32_0 = arith.constant 0 : i32
    %c0_i32_1 = arith.constant 0 : i32
    return %c0_i32, %c0_i32_0 : i32, i32
  }
  func.func @transform_9(%arg0: i32) -> (i32, i32) {
    %c0_i32 = arith.constant 0 : i32
    %c0_i32_0 = arith.constant 0 : i32
    return %c0_i32, %arg0 : i32, i32
  }
}

</mosaic_0001>

<bundles_post_ra>
// kernel: tpu_custom_call.1
= control target key start
LH: loop header
LB: loop body
LE: loop exit
PB: predicated region body
PF: predicated region fallthrough
CT: control target
= control target key end

     0   :  { %s793_s0 = inlined_call_operand.vmem [shape: f32[8,24], index: 0, kind: input, shape index: {}]   ;;  %s794_s1 = inlined_call_operand.vmem [shape: f32[8,8], index: 1, kind: input, shape index: {}]   ;;  %s795_s2 = inlined_call_operand.vmem [shape: f32[32,24], index: 2, kind: input, shape index: {}]   ;;  %s796_s3 = inlined_call_operand.vmem [shape: f32[32,8], index: 3, kind: input, shape index: {}]   ;;  %s797_s4 = inlined_call_operand.vmem [shape: f32[32,1], index: 4, kind: input, shape index: {}]   ;;  %s798_s5 = inlined_call_operand.vmem [shape: f32[32,32], index: 5, kind: input, shape index: {}]   ;;  %s799_s6 = inlined_call_operand.vmem [shape: f32[32,1], index: 6, kind: input, shape index: {}]   ;;  %s800_s7 = inlined_call_operand.vmem [shape: f32[1,32], index: 7, kind: input, shape index: {}]   ;;  %s801_s8 = inlined_call_operand.<no memory space> [shape: f32[1,1], index: 8, kind: input, shape index: {}]   ;;  %s802_s9 = inlined_call_operand.hbm [shape: f32[1,8], index: 9, kind: output, shape index: {}]  }
   0x1   :  { %v14_v0 = vstv %s801_s8 }
   0x2   :  { %15 = vst [vmem:[#allocation2] sm:$0x1] %v14_v0 }
   0x3   :  { %v44_v1 = vld [vmem:[%s794_s1] sm:$0xff]  ;;  %vm45_vm0 = vcmask 64512   ;;  %vm146_vm1 = vcmask 195584   ;;  %v41_v4 = vld [vmem:[%s796_s3 + $0x8] sm:$0xff]  ;;  %v637_v5 = vmov 0   ;;  %v42_v6 = vld [vmem:[%s796_s3 + $0x10] sm:$0xff] }
   0x4   :  { %v40_v2 = vld [vmem:[%s796_s3] sm:$0xff]  ;;  %547 = vmatprep.subr.msk.mxu0 %vm45_vm0, %v44_v1  ;;  %611 = vset.pattern.permute.xlu0 %v637_v5  ;;  %v249_v8 = vld [vmem:[%s797_s4 + $0x10] sm:$0xff]  ;;  %v248_v9 = vld [vmem:[%s797_s4 + $0x8] sm:$0xff] }
   0x5   :  { %549 = vmatprep.mubr.msk.f32.mxu0 %vm45_vm0, %v40_v2  ;;  %v39_v3 = vld [vmem:[%s793_s0] sm:$0xff]  ;;  %548 = vmatpush3.xpose.msk.msra.mxu0 %vm45_vm0, %v44_v1  ;;  %v43_v10 = vld [vmem:[%s796_s3 + $0x18] sm:$0xff] }
   0x6   :  { %555 = vmatprep.subr.msk.mxu0 %vm146_vm1, %v39_v3  ;;  %v247_v7 = vld [vmem:[%s797_s4] sm:$0xff]  ;;  %612 = vset.pattern.permute.xlu1 %v637_v5  ;;  %v250_v11 = vld [vmem:[%s797_s4 + $0x18] sm:$0xff] }
   0x7   :  { %253 = vperm.xlu0 %611, %v247_v7   ;;  %263 = vperm.xlu1 %612, %v249_v8  }
   0x8   :  { %550 = vmatmul.mubr.msk.f32.vlgmr.msra.gmra.mrb[0].mxu0 %vm45_vm0, %v41_v4 }
   0x9   :  { %556 = vmatpush3.xpose.msk.msra.mxu0 %vm146_vm1, %v39_v3  ;;  %552 = vmatprep.mubr.msk.f32.mxu0 %vm45_vm0, %v42_v6 }
   0xa   :  { %16 = vsyncpa [#allocation4], 0  ;;  %v35_v12 = vld [vmem:[%s795_s2] sm:$0xff]  ;;  %v36_v14 = vld [vmem:[%s795_s2 + $0x8] sm:$0xff]  ;;  %vm307_vm2 = vcmask 261120   ;;  %v638_v43 = vmov 0.0|0.0   ;;  %v416_v0 = vlaneseq }
   0xb   :  { %258 = vperm.xlu0 %611, %v248_v9   ;;  %v283_v13 = vld [vmem:[%s799_s6] sm:$0xff]  ;;  %268 = vperm.xlu1 %612, %v250_v11   ;;  %v284_v15 = vld [vmem:[%s799_s6 + $0x8] sm:$0xff]  ;;  %v37_v16 = vld [vmem:[%s795_s2 + $0x10] sm:$0xff]  ;;  %vm639_vm3 = vmmov 0   ;;  %v640_v44 = vmov 0.0   ;;  %s641_s25 = smov [#allocation3]  }
   0xc   :  { %553 = vmatmul.mubr.msk.f32.gmra.mrb[2].mxu0 %vm45_vm0, %v43_v10  ;;  %v285_v17 = vld [vmem:[%s799_s6 + $0x10] sm:$0xff]  ;;  %v38_v18 = vld [vmem:[%s795_s2 + $0x18] sm:$0xff]  ;;  %v410_v20 = vld [vmem:[#allocation2] sm:$0x1]  ;;  %v417_v1 = vshrl.u32 %v416_v0, 7  ;;  %s501_s26 = sshll.u32 %s641_s25, 4  ;;  %s502_s26 = int_to_ptr.vmem [resolvable:$true] %s501_s26 }
   0xd   :  { %557 = vmatprep.mubr.msk.f32.mxu0 %vm146_vm1, %v35_v12  ;;  %v286_v19 = vld [vmem:[%s799_s6 + $0x18] sm:$0xff]  ;;  %v279_v21 = vld [vmem:[%s798_s5] sm:$0xff]  ;;  %v280_v40 = vld [vmem:[%s798_s5 + $0x8] sm:$0xff]  ;;  %vm493_vm4 = vcmask 57344   ;;  %s613_s27 = scalar_lea.vmem %s502_s26, 16  ;;  %s617_s28 = scalar_lea.vmem %s502_s26, 32 }
   0xe   :  { %571 = vmatprep.mubr.msk.f32.mxu1 %vm307_vm2, %v279_v21  ;;  %v281_v41 = vld [vmem:[%s798_s5 + $0x10] sm:$0xff]  ;;  %v282_v42 = vld [vmem:[%s798_s5 + $0x18] sm:$0xff]  ;;  %v409_v63 = vld [vmem:[%s800_s7] sm:$0x1]  ;;  %v418_v2 = vsub.s32 0, %v417_v1  ;;  %p614_p0 = scmp.ne.s32.totalorder %s502_s26, %s613_s27  ;;  %p618_p1 = scmp.lt.s32.totalorder %s502_s26, %s502_s26 }
   0xf   :  { %289 = vperm.xlu0 %611, %v283_v13   ;;  %294 = vperm.xlu1 %612, %v284_v15   ;;  %p619_p2 = scmp.lt.s32.totalorder %s617_s28, %s613_s27 }
  0x10   :  { %558 = vmatmul.mubr.msk.f32.vlgmr.msra.gmra.mrb[0].mxu0 %vm146_vm1, %v36_v14 }
  0x11   :  { %560 = vmatprep.mubr.msk.f32.mxu0 %vm146_vm1, %v37_v16  ;;  %p620_p3 = por %p619_p2, %p618_p1 }
  0x13   :  { %299 = vperm.xlu0 %611, %v285_v17   ;;  %304 = vperm.xlu1 %612, %v286_v19   ;;  %p621_p4 = pnand %p620_p3, %p614_p0 }
  0x14   :  { %561 = vmatmul.mubr.msk.f32.gmra.mrb[2].mxu0 %vm146_vm1, %v38_v18 }
  0x17   :  { %413 = vperm.xlu0 %611, %v410_v20  }
  0x86   :  { %v254_v22 = vpop.permute.xlu0 %253  ;;  %v264_v23 = vpop.permute.xlu1 %263 }
  0x8a   :  { %v259_v24 = vpop.permute.xlu0 %258  ;;  %v269_v30 = vpop.permute.xlu1 %268 }
  0x8e   :  { %v295_v45 = vpop.permute.xlu1 %294  ;;  %v290_v46 = vpop.permute.xlu0 %289 }
  0x92   :  { %v305_v52 = vpop.permute.xlu1 %304  ;;  %v300_v55 = vpop.permute.xlu0 %299 }
  0x96   :  { %v414_v3 = vpop.permute.xlu0 %413 }
  0x97   :  { %v419_v4 = vrot.slane %v414_v3, %v418_v2 }
  0xe3   :  { %v559_v25 = vpop.f32.mrb[0].mxu0 }
  0xe4   :  { %v272_v26 = vadd.f32 %v559_v25, %v259_v24  ;;  %v228_v27 = vpop.f32.mrb[1].mxu0 }
  0xe5   :  { %v271_v28 = vadd.f32 %v254_v22, %v228_v27 }
  0xe6   :  { %v276_v29 = vmax.f32 %v272_v26, 0.0 }
  0xe7   :  { %v275_v31 = vmax.f32 %v271_v28, 0.0  ;;  %v562_v32 = vpop.f32.mrb[2].mxu0 }
  0xe8   :  { %v274_v33 = vadd.f32 %v562_v32, %v269_v30  ;;  %v238_v34 = vpop.f32.mrb[3].mxu0 }
  0xe9   :  { %v273_v35 = vadd.f32 %v264_v23, %v238_v34  ;;  %v588_v36 = vpack.c.bf16 %v276_v29, %v275_v31 }
  0xea   :  { %v278_v37 = vmax.f32 %v274_v33, 0.0 }
  0xeb   :  { %v277_v38 = vmax.f32 %v273_v35, 0.0  ;;  %589 = vmatprep.subr.bf16.mxu1 %v588_v36 }
  0xec   :  { %591 = vmatpush3.bf16.msra.mxu1 %v588_v36 }
  0xed   :  { %v592_v39 = vpack.c.bf16 %v278_v37, %v277_v38 }
  0xef   :  { %593 = vmatprep.subr.bf16.mxu1 %v592_v39 }
  0xf0   :  { %595 = vmatpush3.bf16.msra.mxu1 %v592_v39 }
  0xf1   :  { %596 = vmatprep.subr.bf16.mxu1 %v638_v43 }
  0xf3   :  { %572 = vmatmul.mubr.msk.f32.vlgmr.msra.gmra.mrb[0].mxu1 %vm307_vm2, %v280_v40 }
  0xf4   :  { %574 = vmatprep.mubr.msk.f32.mxu1 %vm307_vm2, %v281_v41 }
  0xf7   :  { %575 = vmatmul.mubr.msk.f32.gmra.mrb[2].mxu1 %vm307_vm2, %v282_v42 }
  0xf8   :  { %585 = vmatprep.mubr.msk.f32.mxu1 %vm639_vm3, %v640_v44 }
 0x1c6   :  { %v573_v47 = vpop.f32.mrb[0].mxu1 }
 0x1c7   :  { %v392_v48 = vadd.f32 %v573_v47, %v295_v45  ;;  %v386_v49 = vpop.f32.mrb[1].mxu1 }
 0x1c8   :  { %v387_v50 = vadd.f32 %v386_v49, %v290_v46 }
 0x1c9   :  { %v406_v51 = vmax.f32 %v392_v48, 0.0 }
 0x1ca   :  { %v405_v53 = vmax.f32 %v387_v50, 0.0  ;;  %v576_v54 = vpop.f32.mrb[2].mxu1 }
 0x1cb   :  { %v402_v56 = vadd.f32 %v576_v54, %v305_v52  ;;  %v396_v57 = vpop.f32.mrb[3].mxu1 }
 0x1cc   :  { %v597_v58 = vpack.c.bf16 %v406_v51, %v405_v53  ;;  %v397_v59 = vadd.f32 %v396_v57, %v300_v55 }
 0x1cd   :  { %v408_v60 = vmax.f32 %v402_v56, 0.0 }
 0x1ce   :  { %v407_v61 = vmax.f32 %v397_v59, 0.0  ;;  %598 = vmatpush3.bf16.msra.mxu1 %v597_v58 }
 0x1cf   :  { %599 = vmatprep.subr.bf16.mxu1 %v638_v43 }
 0x1d0   :  { %v600_v62 = vpack.c.bf16 %v408_v60, %v407_v61 }
 0x1d2   :  { %601 = vmatpush3.bf16.msra.mxu1 %v600_v62 }
 0x1d5   :  { %586 = vmatmul.mubr.msk.f32.vlgmr.msra.gmra.mrb[4].mxu1 %vm307_vm2, %v409_v63 }
 0x2a8   :  { %v489_v5 = vpop.f32.mrb[4].mxu1 }
 0x2a9   :  { %v490_v6 = vadd.f32 %v489_v5, %v419_v4  ;;  %v587_v7 = vpop.f32.mrb[5].mxu1 }
 0x2ab   :  { %494 = vst.msk [vmem:[#allocation3] sm:$0x1] %vm493_vm4, %v490_v6 }
 0x2ac   :  { %624 = shalt.err (!%p621_p4)
}
 0x2ad   :  { %s625_s30 = scalar_lea.hbm %s802_s9, 16 }
 0x2ae   :  { %p626_p5 = scmp.ne.s32.totalorder %s802_s9, %s625_s30  ;;  %p629_p6 = scmp.lt.u32.totalorder %s625_s30, %s802_s9 }
 0x2b0   :  { %p631_p7 = pnand %p629_p6, %p626_p5 }
 0x2b2   :  { %634 = shalt.err (!%p631_p7)
}
 0x2b3   :  { %504 = dma.vmem_to_hbm [thread:$0]  %s502_s26, 16, %s802_s9, [#allocation4]  }
 0x2b4   :  { %635 = dma.done.wait [#allocation4], 16  }
 0x2b5   :  { %636 = vsyncadd [#allocation4], 4294967280 }
 0x2b6   :  { %508 = vsyncpa [#allocation4], 1 }

</bundles_post_ra>
